<compile_context>
chip_gen: v7x
topology: tpu7x:2x2x1
jax: 0.10.0
libtpu: 0.0.40
codegen_flags: <defaults>
</compile_context>

<pallas_src>
import math

import jax
import jax.numpy as jnp
from jax import lax
from jax.experimental import pallas as pl
from jax.experimental.pallas import tpu as pltpu


def _round_up(x, m):
    return ((x + m - 1) // m) * m


def _tpu_vmem_bytes():
    """Physical per-core VMEM, with a conservative fallback."""
    try:
        return int(pltpu.get_tpu_info().vmem_capacity_bytes)
    except Exception:
        try:
            kind = jax.devices()[0].device_kind.lower()
        except Exception:
            kind = ""
        return (64 << 20) if "v7" in kind else (128 << 20)


def _choose_tiles(S):
    """Return (padded seq len, query tile). MXU M-dim: 128 on v5*, 256 on v6e/v7x."""
    try:
        kind = jax.devices()[0].device_kind.lower()
    except Exception:
        kind = ""
    cap = 128 if "v5" in kind else 256
    if S <= cap:
        Sp = _round_up(S, 8)          # sublane-aligned single tile
        return Sp, Sp
    TQ = cap
    return _round_up(S, TQ), TQ       # pad S up; padded keys are masked


def self_attention(x, wq, bq, wk, bk, wv, bv):
    """x: (B, S, D); w*: (D, D) torch layout (out, in); b*: (D,)."""
    B, S, D = x.shape
    scale = 1.0 / math.sqrt(D)                 # d_k == d_model in the module
    Dp = _round_up(D, 128)                     # lane-dense feature width
    pad_d = Dp - D
    Sp, TQ = _choose_tiles(S)
    pad_s = Sp - S
    n_q = Sp // TQ
    cdtype = x.dtype                           # MXU operand / scratch dtype

    def prep_w(w):                             # (out,in) -> (in,out), zero-pad
        return jnp.pad(w.T, ((0, pad_d), (0, pad_d)))

    def prep_b(b):
        return jnp.pad(b, (0, pad_d))

    # Query projection with 1/sqrt(d_k) folded in; fused [K | V] projection.
    w_q = (prep_w(wq) * scale).astype(cdtype)
    b_q = (prep_b(bq) * scale).astype(jnp.float32).reshape(1, Dp)
    w_kv = jnp.concatenate([prep_w(wk), prep_w(wv)], axis=1).astype(cdtype)
    b_kv = jnp.concatenate([prep_b(bk), prep_b(bv)]
                           ).astype(jnp.float32).reshape(1, 2 * Dp)
    x_p = jnp.pad(x, ((0, 0), (0, pad_s), (0, pad_d)))         # (B, Sp, Dp)

    def kernel(x_ref, wq_ref, bq_ref, wkv_ref, bkv_ref, o_ref, kv_s):
        """One grid step = (batch b, query tile qi).

        x_ref:   (1, Sp, Dp)  full (padded) sequence of batch b, native dtype
        wq_ref:  (Dp, Dp)     pre-transposed Wq * 1/sqrt(d_k), native dtype
        bq_ref:  (1, Dp)      bq * 1/sqrt(d_k), f32
        wkv_ref: (Dp, 2*Dp)   pre-transposed [Wk | Wv], native dtype
        bkv_ref: (1, 2*Dp)    [bk | bv], f32
        o_ref:   (1, TQ, Dp)  output tile
        kv_s:    (Sp, 2*Dp)   K/V scratch (input dtype), filled once per batch
        """
        qi = pl.program_id(1)

        # Fused K/V projection, once per batch, written straight to scratch.
        @pl.when(qi == 0)
        def _():
            kv = jnp.dot(x_ref[0], wkv_ref[...],
                         preferred_element_type=jnp.float32)
            kv_s[...] = (kv + bkv_ref[...]).astype(kv_s.dtype)

        # Per-tile query projection: (TQ, Dp) x (Dp, Dp) on the MXU.
        row = pl.multiple_of(qi * TQ, TQ)
        x_tile = x_ref[0, pl.ds(row, TQ), :]                    # (TQ, Dp)
        q = jnp.dot(x_tile, wq_ref[...],
                    preferred_element_type=jnp.float32)
        q = (q + bq_ref[...]).astype(kv_s.dtype)

        k = kv_s[:, :Dp]                                        # static views
        v = kv_s[:, Dp:]
        # q @ k^T: contract last axes -> MXU-native transposed-RHS, no XLU xpose.
        s = lax.dot_general(q, k, (((1,), (1,)), ((), ())),
                            preferred_element_type=jnp.float32)  # (TQ, Sp)
        if pad_s:  # static branch: mask padded key columns
            key_idx = lax.broadcasted_iota(jnp.int32, (TQ, Sp), 1)
            s = jnp.where(key_idx < S, s, -jnp.inf)
        m = jnp.max(s, axis=-1, keepdims=True)
        p = jnp.exp(s - m)                                       # f32 probs
        l = jnp.sum(p, axis=-1, keepdims=True)                   # (TQ, 1)
        acc = jnp.dot(p.astype(kv_s.dtype), v,
                      preferred_element_type=jnp.float32)        # (TQ, Dp)
        # Deferred normalization: EUP approx reciprocal + one NR refinement.
        inv = pl.reciprocal(l, approx=True)
        inv = inv * (2.0 - l * inv)
        o_ref[0] = (acc * inv).astype(o_ref.dtype)

    # ---- VMEM budget (includes the qi==0 projection temporary) ----
    isz = jnp.dtype(cdtype).itemsize
    est = (2 * Sp * Dp * isz                  # x block (double-buffered)
           + Dp * 3 * Dp * isz + 3 * Dp * 4   # Wq/Wkv + biases
           + 2 * TQ * Dp * isz                # output tile (double-buffered)
           + Sp * 2 * Dp * isz                # K/V scratch
           + Sp * 2 * Dp * 4                  # qi==0 f32 projection temporary
           + 4 * TQ * Sp * 4                  # scores / exp / mask temporaries
           + 3 * TQ * Dp * 4)                 # q tile / acc f32 temporaries
    phys = _tpu_vmem_bytes()
    vmem_limit = int(min(max(int(1.5 * est), 16 << 20), int(0.85 * phys)))

    def run(single_buffer_consts):
        # Constant-across-grid blocks: single buffer saves VMEM at zero cost.
        ckw = ({"pipeline_mode": pl.Buffered(1)}
               if single_buffer_consts else {})
        grid_spec = pltpu.PrefetchScalarGridSpec(
            num_scalar_prefetch=0,
            grid=(B, n_q),
            in_specs=[
                pl.BlockSpec((1, Sp, Dp), lambda b, qi: (b, 0, 0)),       # x
                pl.BlockSpec((Dp, Dp), lambda b, qi: (0, 0), **ckw),      # Wq
                pl.BlockSpec((1, Dp), lambda b, qi: (0, 0), **ckw),       # bq
                pl.BlockSpec((Dp, 2 * Dp), lambda b, qi: (0, 0), **ckw),  # Wkv
                pl.BlockSpec((1, 2 * Dp), lambda b, qi: (0, 0), **ckw),   # bkv
            ],
            out_specs=pl.BlockSpec((1, TQ, Dp), lambda b, qi: (b, qi, 0)),
            scratch_shapes=[pltpu.VMEM((Sp, 2 * Dp), cdtype)],            # K|V
        )
        return pl.pallas_call(
            kernel,
            out_shape=jax.ShapeDtypeStruct((B, Sp, Dp), x.dtype),
            grid_spec=grid_spec,
            compiler_params=pltpu.CompilerParams(
                dimension_semantics=("parallel", "arbitrary"),
                vmem_limit_bytes=vmem_limit),
        )(x_p, w_q, b_q, w_kv, b_kv)

    try:
        out = run(True)
    except Exception:
        # pl.Buffered(1)/pipeline_mode not accepted by this build; fall back to
        # default double-buffered constant blocks (identical semantics).
        out = run(False)

    if pad_s or pad_d:
        out = out[:, :S, :D]
    return out


def _reference(x, wq, bq, wk, bk, wv, bv):
    q = jnp.einsum('bsd,od->bso', x, wq) + bq
    k = jnp.einsum('bsd,od->bso', x, wk) + bk
    v = jnp.einsum('bsd,od->bso', x, wv) + bv
    d_model = x.shape[-1]
    scores = jnp.einsum('bqd,bkd->bqk', q, k) / (d_model ** 0.5)
    p = jax.nn.softmax(scores, axis=-1)
    return jnp.einsum('bqk,bkd->bqd', p, v)


if __name__ == "__main__":
    # Small shapes consistent with the module: (batch, seq_len, d_model)
    B, S, D = 2, 8, 32

    key = jax.random.PRNGKey(0)
    kx, kwq, kbq, kwk, kbk, kwv, kbv = jax.random.split(key, 7)

    x = jax.random.normal(kx, (B, S, D), dtype=jnp.float32)
    # Deterministic nn.Linear-like init: uniform(-1/sqrt(D), 1/sqrt(D))
    lim = 1.0 / (D ** 0.5)
    wq = jax.random.uniform(kwq, (D, D), minval=-lim, maxval=lim, dtype=jnp.float32)
    bq = jax.random.uniform(kbq, (D,),   minval=-lim, maxval=lim, dtype=jnp.float32)
    wk = jax.random.uniform(kwk, (D, D), minval=-lim, maxval=lim, dtype=jnp.float32)
    bk = jax.random.uniform(kbk, (D,),   minval=-lim, maxval=lim, dtype=jnp.float32)
    wv = jax.random.uniform(kwv, (D, D), minval=-lim, maxval=lim, dtype=jnp.float32)
    bv = jax.random.uniform(kbv, (D,),   minval=-lim, maxval=lim, dtype=jnp.float32)

    out = self_attention(x, wq, bq, wk, bk, wv, bv)
    out = jax.block_until_ready(out)

    ref = _reference(x, wq, bq, wk, bk, wv, bv)
    assert out.shape == (B, S, D)
    assert jnp.allclose(out, ref, atol=1e-4, rtol=1e-4), float(
        jnp.max(jnp.abs(out - ref)))

    print("KERNEL_OK")
</pallas_src>

<mosaic_0001>
module attributes {stable_mosaic.version = 11 : i64} {
  func.func @kernel(%arg0: i32, %arg1: i32, %arg2: memref<1x8x128xf32, #tpu.memory_space<vmem>>, %arg3: memref<128x128xf32, #tpu.memory_space<vmem>>, %arg4: memref<1x128xf32, #tpu.memory_space<vmem>>, %arg5: memref<128x256xf32, #tpu.memory_space<vmem>>, %arg6: memref<1x256xf32, #tpu.memory_space<vmem>>, %arg7: memref<1x8x128xf32, #tpu.memory_space<vmem>>, %arg8: memref<8x256xf32, #tpu.memory_space<vmem>>) attributes {dimension_semantics = [#tpu.dimension_semantics<parallel>, #tpu.dimension_semantics<arbitrary>], iteration_bounds = array<i64: 2, 1>, scalar_prefetch = 0 : i64, scratch_operands = 1 : i64, tpu.core_type = #tpu.core_type<tc>, window_params = [{transform_indices = @transform_0, window_bounds = array<i64: 1, 8, 128>}, {pipeline_mode = #tpu.pipeline_mode<synchronous>, transform_indices = @transform_1, window_bounds = array<i64: 128, 128>}, {pipeline_mode = #tpu.pipeline_mode<synchronous>, transform_indices = @transform_2, window_bounds = array<i64: 1, 128>}, {pipeline_mode = #tpu.pipeline_mode<synchronous>, transform_indices = @transform_3, window_bounds = array<i64: 128, 256>}, {pipeline_mode = #tpu.pipeline_mode<synchronous>, transform_indices = @transform_4, window_bounds = array<i64: 1, 256>}, {transform_indices = @transform_5, window_bounds = array<i64: 1, 8, 128>}]} {
    %c0_i32 = arith.constant 0 : i32
    %0 = arith.cmpi eq, %arg1, %c0_i32 : i32
    %1 = arith.extui %0 : i1 to i32
    %c0_i32_0 = arith.constant 0 : i32
    %2 = arith.cmpi ne, %1, %c0_i32_0 : i32
    scf.if %2 {
      %c0_17 = arith.constant 0 : index
      %c0_18 = arith.constant 0 : index
      %c0_19 = arith.constant 0 : index
      %34 = vector.load %arg2[%c0_17, %c0_18, %c0_19] : memref<1x8x128xf32, #tpu.memory_space<vmem>>, vector<1x8x128xf32>
      %35 = vector.shape_cast %34 : vector<1x8x128xf32> to vector<8x128xf32>
      %c0_20 = arith.constant 0 : index
      %c0_21 = arith.constant 0 : index
      %36 = vector.load %arg5[%c0_20, %c0_21] : memref<128x256xf32, #tpu.memory_space<vmem>>, vector<128x256xf32>
      %cst_22 = arith.constant dense<0.000000e+00> : vector<8x256xf32>
      %37 = tpu.matmul %35, %36, %cst_22 {dimension_numbers = #tpu.dot_dimension_numbers<[1], [0], [0], [1], [0, 0, 1, 1], [], []>} : vector<8x128xf32>, vector<128x256xf32>, vector<8x256xf32> -> vector<8x256xf32>
      %c0_23 = arith.constant 0 : index
      %c0_24 = arith.constant 0 : index
      %38 = vector.load %arg6[%c0_23, %c0_24] : memref<1x256xf32, #tpu.memory_space<vmem>>, vector<1x256xf32>
      %39 = vector.broadcast %38 : vector<1x256xf32> to vector<8x256xf32>
      %40 = arith.addf %37, %39 : vector<8x256xf32>
      %c0_25 = arith.constant 0 : index
      %c0_26 = arith.constant 0 : index
      %41 = vector.load %arg8[%c0_25, %c0_26] : memref<8x256xf32, #tpu.memory_space<vmem>>, vector<8x256xf32>
      tpu.vector_store %arg8[%c0_25, %c0_26], %40 {strides = array<i32>} : memref<8x256xf32, #tpu.memory_space<vmem>>, vector<8x256xf32>,
    } else {
    }
    %c8_i32 = arith.constant 8 : i32
    %3 = arith.muli %arg1, %c8_i32 : i32
    %4 = tpu.assume_multiple %3, 8 : i32
    %c0 = arith.constant 0 : index
    %5 = arith.index_cast %4 : i32 to index
    %c0_1 = arith.constant 0 : index
    %6 = vector.load %arg2[%c0, %5, %c0_1] : memref<1x8x128xf32, #tpu.memory_space<vmem>>, vector<1x8x128xf32>
    %7 = vector.shape_cast %6 : vector<1x8x128xf32> to vector<8x128xf32>
    %c0_2 = arith.constant 0 : index
    %c0_3 = arith.constant 0 : index
    %8 = vector.load %arg3[%c0_2, %c0_3] : memref<128x128xf32, #tpu.memory_space<vmem>>, vector<128x128xf32>
    %cst = arith.constant dense<0.000000e+00> : vector<8x128xf32>
    %9 = tpu.matmul %7, %8, %cst {dimension_numbers = #tpu.dot_dimension_numbers<[1], [0], [0], [1], [0, 0, 1, 1], [], []>} : vector<8x128xf32>, vector<128x128xf32>, vector<8x128xf32> -> vector<8x128xf32>
    %c0_4 = arith.constant 0 : index
    %c0_5 = arith.constant 0 : index
    %10 = vector.load %arg4[%c0_4, %c0_5] : memref<1x128xf32, #tpu.memory_space<vmem>>, vector<1x128xf32>
    %11 = vector.broadcast %10 : vector<1x128xf32> to vector<8x128xf32>
    %12 = arith.addf %9, %11 : vector<8x128xf32>
    %c0_6 = arith.constant 0 : index
    %c0_7 = arith.constant 0 : index
    %13 = vector.load %arg8[%c0_6, %c0_7] : memref<8x256xf32, #tpu.memory_space<vmem>>, vector<8x128xf32>
    %c0_8 = arith.constant 0 : index
    %c128 = arith.constant 128 : index
    %14 = vector.load %arg8[%c0_8, %c128] : memref<8x256xf32, #tpu.memory_space<vmem>>, vector<8x128xf32>
    %cst_9 = arith.constant dense<0.000000e+00> : vector<8x8xf32>
    %15 = tpu.matmul %12, %13, %cst_9 {dimension_numbers = #tpu.dot_dimension_numbers<[1], [1], [0], [0], [0, 0, 1, 0], [], []>} : vector<8x128xf32>, vector<8x128xf32>, vector<8x8xf32> -> vector<8x8xf32>
    %cst_10 = arith.constant dense<0xFF800000> : vector<8xf32>
    %16 = vector.multi_reduction <maximumf>, %15, %cst_10 [1] : vector<8x8xf32> to vector<8xf32>
    %17 = vector.shape_cast %16 : vector<8xf32> to vector<8x1xf32>
    %18 = vector.broadcast %17 : vector<8x1xf32> to vector<8x8xf32>
    %19 = arith.subf %15, %18 : vector<8x8xf32>
    %20 = math.exp %19 : vector<8x8xf32>
    %cst_11 = arith.constant dense<0.000000e+00> : vector<8xf32>
    %21 = vector.multi_reduction <add>, %20, %cst_11 [1] : vector<8x8xf32> to vector<8xf32>
    %22 = vector.shape_cast %21 : vector<8xf32> to vector<8x1xf32>
    %cst_12 = arith.constant dense<0.000000e+00> : vector<8x128xf32>
    %23 = tpu.matmul %20, %14, %cst_12 {dimension_numbers = #tpu.dot_dimension_numbers<[1], [0], [0], [1], [0, 0, 1, 1], [], []>} : vector<8x8xf32>, vector<8x128xf32>, vector<8x128xf32> -> vector<8x128xf32>
    %24 = tpu.reciprocal %22 {approx = true} : vector<8x1xf32> -> vector<8x1xf32>
    %25 = arith.mulf %22, %24 : vector<8x1xf32>
    %cst_13 = arith.constant 2.000000e+00 : f32
    %26 = vector.broadcast %cst_13 : f32 to vector<8x1xf32>
    %27 = arith.subf %26, %25 : vector<8x1xf32>
    %28 = arith.mulf %24, %27 : vector<8x1xf32>
    %29 = vector.broadcast %28 : vector<8x1xf32> to vector<8x128xf32>
    %30 = arith.mulf %23, %29 : vector<8x128xf32>
    %c0_14 = arith.constant 0 : index
    %c0_15 = arith.constant 0 : index
    %c0_16 = arith.constant 0 : index
    %31 = vector.load %arg7[%c0_14, %c0_15, %c0_16] : memref<1x8x128xf32, #tpu.memory_space<vmem>>, vector<1x8x128xf32>
    %32 = vector.shape_cast %31 : vector<1x8x128xf32> to vector<8x128xf32>
    %33 = vector.shape_cast %30 : vector<8x128xf32> to vector<1x8x128xf32>
    tpu.vector_store %arg7[%c0_14, %c0_15, %c0_16], %33 {strides = array<i32>} : memref<1x8x128xf32, #tpu.memory_space<vmem>>, vector<1x8x128xf32>,
    return
  }
  func.func @transform_0(%arg0: i32, %arg1: i32) -> (i32, i32, i32) {
    %c0_i32 = arith.constant 0 : i32
    %c0_i32_0 = arith.constant 0 : i32
    %c0_i32_1 = arith.constant 0 : i32
    return %arg0, %c0_i32, %c0_i32_0 : i32, i32, i32
  }
  func.func @transform_1(%arg0: i32, %arg1: i32) -> (i32, i32) {
    %c0_i32 = arith.constant 0 : i32
    %c0_i32_0 = arith.constant 0 : i32
    %c0_i32_1 = arith.constant 0 : i32
    return %c0_i32, %c0_i32_0 : i32, i32
  }
  func.func @transform_2(%arg0: i32, %arg1: i32) -> (i32, i32) {
    %c0_i32 = arith.constant 0 : i32
    %c0_i32_0 = arith.constant 0 : i32
    %c0_i32_1 = arith.constant 0 : i32
    return %c0_i32, %c0_i32_0 : i32, i32
  }
  func.func @transform_3(%arg0: i32, %arg1: i32) -> (i32, i32) {
    %c0_i32 = arith.constant 0 : i32
    %c0_i32_0 = arith.constant 0 : i32
    %c0_i32_1 = arith.constant 0 : i32
    return %c0_i32, %c0_i32_0 : i32, i32
  }
  func.func @transform_4(%arg0: i32, %arg1: i32) -> (i32, i32) {
    %c0_i32 = arith.constant 0 : i32
    %c0_i32_0 = arith.constant 0 : i32
    %c0_i32_1 = arith.constant 0 : i32
    return %c0_i32, %c0_i32_0 : i32, i32
  }
  func.func @transform_5(%arg0: i32, %arg1: i32) -> (i32, i32, i32) {
    %c0_i32 = arith.constant 0 : i32
    %c0_i32_0 = arith.constant 0 : i32
    return %arg0, %arg1, %c0_i32 : i32, i32, i32
  }
}

module attributes {stable_mosaic.version = 11 : i64} {
  func.func @kernel(%arg0: i32, %arg1: i32, %arg2: memref<1x8x128xf32, #tpu.memory_space<vmem>>, %arg3: memref<128x128xf32, #tpu.memory_space<vmem>>, %arg4: memref<1x128xf32, #tpu.memory_space<vmem>>, %arg5: memref<128x256xf32, #tpu.memory_space<vmem>>, %arg6: memref<1x256xf32, #tpu.memory_space<vmem>>, %arg7: memref<1x8x128xf32, #tpu.memory_space<vmem>>, %arg8: memref<8x256xf32, #tpu.memory_space<vmem>>) attributes {dimension_semantics = [#tpu.dimension_semantics<parallel>, #tpu.dimension_semantics<arbitrary>], iteration_bounds = array<i64: 2, 1>, scalar_prefetch = 0 : i64, scratch_operands = 1 : i64, tpu.core_type = #tpu.core_type<tc>, window_params = [{transform_indices = @transform_0, window_bounds = array<i64: 1, 8, 128>}, {pipeline_mode = #tpu.pipeline_mode<synchronous>, transform_indices = @transform_1, window_bounds = array<i64: 128, 128>}, {pipeline_mode = #tpu.pipeline_mode<synchronous>, transform_indices = @transform_2, window_bounds = array<i64: 1, 128>}, {pipeline_mode = #tpu.pipeline_mode<synchronous>, transform_indices = @transform_3, window_bounds = array<i64: 128, 256>}, {pipeline_mode = #tpu.pipeline_mode<synchronous>, transform_indices = @transform_4, window_bounds = array<i64: 1, 256>}, {transform_indices = @transform_5, window_bounds = array<i64: 1, 8, 128>}]} {
    %c0_i32 = arith.constant 0 : i32
    %0 = arith.cmpi eq, %arg1, %c0_i32 : i32
    %1 = arith.extui %0 : i1 to i32
    %c0_i32_0 = arith.constant 0 : i32
    %2 = arith.cmpi ne, %1, %c0_i32_0 : i32
    scf.if %2 {
      %c0_17 = arith.constant 0 : index
      %c0_18 = arith.constant 0 : index
      %c0_19 = arith.constant 0 : index
      %34 = vector.load %arg2[%c0_17, %c0_18, %c0_19] : memref<1x8x128xf32, #tpu.memory_space<vmem>>, vector<1x8x128xf32>
      %35 = vector.shape_cast %34 : vector<1x8x128xf32> to vector<8x128xf32>
      %c0_20 = arith.constant 0 : index
      %c0_21 = arith.constant 0 : index
      %36 = vector.load %arg5[%c0_20, %c0_21] : memref<128x256xf32, #tpu.memory_space<vmem>>, vector<128x256xf32>
      %cst_22 = arith.constant dense<0.000000e+00> : vector<8x256xf32>
      %37 = tpu.matmul %35, %36, %cst_22 {dimension_numbers = #tpu.dot_dimension_numbers<[1], [0], [0], [1], [0, 0, 1, 1], [], []>} : vector<8x128xf32>, vector<128x256xf32>, vector<8x256xf32> -> vector<8x256xf32>
      %c0_23 = arith.constant 0 : index
      %c0_24 = arith.constant 0 : index
      %38 = vector.load %arg6[%c0_23, %c0_24] : memref<1x256xf32, #tpu.memory_space<vmem>>, vector<1x256xf32>
      %39 = vector.broadcast %38 : vector<1x256xf32> to vector<8x256xf32>
      %40 = arith.addf %37, %39 : vector<8x256xf32>
      %c0_25 = arith.constant 0 : index
      %c0_26 = arith.constant 0 : index
      %41 = vector.load %arg8[%c0_25, %c0_26] : memref<8x256xf32, #tpu.memory_space<vmem>>, vector<8x256xf32>
      tpu.vector_store %arg8[%c0_25, %c0_26], %40 {strides = array<i32>} : memref<8x256xf32, #tpu.memory_space<vmem>>, vector<8x256xf32>,
    } else {
    }
    %c8_i32 = arith.constant 8 : i32
    %3 = arith.muli %arg1, %c8_i32 : i32
    %4 = tpu.assume_multiple %3, 8 : i32
    %c0 = arith.constant 0 : index
    %5 = arith.index_cast %4 : i32 to index
    %c0_1 = arith.constant 0 : index
    %6 = vector.load %arg2[%c0, %5, %c0_1] : memref<1x8x128xf32, #tpu.memory_space<vmem>>, vector<1x8x128xf32>
    %7 = vector.shape_cast %6 : vector<1x8x128xf32> to vector<8x128xf32>
    %c0_2 = arith.constant 0 : index
    %c0_3 = arith.constant 0 : index
    %8 = vector.load %arg3[%c0_2, %c0_3] : memref<128x128xf32, #tpu.memory_space<vmem>>, vector<128x128xf32>
    %cst = arith.constant dense<0.000000e+00> : vector<8x128xf32>
    %9 = tpu.matmul %7, %8, %cst {dimension_numbers = #tpu.dot_dimension_numbers<[1], [0], [0], [1], [0, 0, 1, 1], [], []>} : vector<8x128xf32>, vector<128x128xf32>, vector<8x128xf32> -> vector<8x128xf32>
    %c0_4 = arith.constant 0 : index
    %c0_5 = arith.constant 0 : index
    %10 = vector.load %arg4[%c0_4, %c0_5] : memref<1x128xf32, #tpu.memory_space<vmem>>, vector<1x128xf32>
    %11 = vector.broadcast %10 : vector<1x128xf32> to vector<8x128xf32>
    %12 = arith.addf %9, %11 : vector<8x128xf32>
    %c0_6 = arith.constant 0 : index
    %c0_7 = arith.constant 0 : index
    %13 = vector.load %arg8[%c0_6, %c0_7] : memref<8x256xf32, #tpu.memory_space<vmem>>, vector<8x128xf32>
    %c0_8 = arith.constant 0 : index
    %c128 = arith.constant 128 : index
    %14 = vector.load %arg8[%c0_8, %c128] : memref<8x256xf32, #tpu.memory_space<vmem>>, vector<8x128xf32>
    %cst_9 = arith.constant dense<0.000000e+00> : vector<8x8xf32>
    %15 = tpu.matmul %12, %13, %cst_9 {dimension_numbers = #tpu.dot_dimension_numbers<[1], [1], [0], [0], [0, 0, 1, 0], [], []>} : vector<8x128xf32>, vector<8x128xf32>, vector<8x8xf32> -> vector<8x8xf32>
    %cst_10 = arith.constant dense<0xFF800000> : vector<8xf32>
    %16 = vector.multi_reduction <maximumf>, %15, %cst_10 [1] : vector<8x8xf32> to vector<8xf32>
    %17 = vector.shape_cast %16 : vector<8xf32> to vector<8x1xf32>
    %18 = vector.broadcast %17 : vector<8x1xf32> to vector<8x8xf32>
    %19 = arith.subf %15, %18 : vector<8x8xf32>
    %20 = math.exp %19 : vector<8x8xf32>
    %cst_11 = arith.constant dense<0.000000e+00> : vector<8xf32>
    %21 = vector.multi_reduction <add>, %20, %cst_11 [1] : vector<8x8xf32> to vector<8xf32>
    %22 = vector.shape_cast %21 : vector<8xf32> to vector<8x1xf32>
    %cst_12 = arith.constant dense<0.000000e+00> : vector<8x128xf32>
    %23 = tpu.matmul %20, %14, %cst_12 {dimension_numbers = #tpu.dot_dimension_numbers<[1], [0], [0], [1], [0, 0, 1, 1], [], []>} : vector<8x8xf32>, vector<8x128xf32>, vector<8x128xf32> -> vector<8x128xf32>
    %24 = tpu.reciprocal %22 {approx = true} : vector<8x1xf32> -> vector<8x1xf32>
    %25 = arith.mulf %22, %24 : vector<8x1xf32>
    %cst_13 = arith.constant 2.000000e+00 : f32
    %26 = vector.broadcast %cst_13 : f32 to vector<8x1xf32>
    %27 = arith.subf %26, %25 : vector<8x1xf32>
    %28 = arith.mulf %24, %27 : vector<8x1xf32>
    %29 = vector.broadcast %28 : vector<8x1xf32> to vector<8x128xf32>
    %30 = arith.mulf %23, %29 : vector<8x128xf32>
    %c0_14 = arith.constant 0 : index
    %c0_15 = arith.constant 0 : index
    %c0_16 = arith.constant 0 : index
    %31 = vector.load %arg7[%c0_14, %c0_15, %c0_16] : memref<1x8x128xf32, #tpu.memory_space<vmem>>, vector<1x8x128xf32>
    %32 = vector.shape_cast %31 : vector<1x8x128xf32> to vector<8x128xf32>
    %33 = vector.shape_cast %30 : vector<8x128xf32> to vector<1x8x128xf32>
    tpu.vector_store %arg7[%c0_14, %c0_15, %c0_16], %33 {strides = array<i32>} : memref<1x8x128xf32, #tpu.memory_space<vmem>>, vector<1x8x128xf32>,
    return
  }
  func.func @transform_0(%arg0: i32, %arg1: i32) -> (i32, i32, i32) {
    %c0_i32 = arith.constant 0 : i32
    %c0_i32_0 = arith.constant 0 : i32
    %c0_i32_1 = arith.constant 0 : i32
    return %arg0, %c0_i32, %c0_i32_0 : i32, i32, i32
  }
  func.func @transform_1(%arg0: i32, %arg1: i32) -> (i32, i32) {
    %c0_i32 = arith.constant 0 : i32
    %c0_i32_0 = arith.constant 0 : i32
    %c0_i32_1 = arith.constant 0 : i32
    return %c0_i32, %c0_i32_0 : i32, i32
  }
  func.func @transform_2(%arg0: i32, %arg1: i32) -> (i32, i32) {
    %c0_i32 = arith.constant 0 : i32
    %c0_i32_0 = arith.constant 0 : i32
    %c0_i32_1 = arith.constant 0 : i32
    return %c0_i32, %c0_i32_0 : i32, i32
  }
  func.func @transform_3(%arg0: i32, %arg1: i32) -> (i32, i32) {
    %c0_i32 = arith.constant 0 : i32
    %c0_i32_0 = arith.constant 0 : i32
    %c0_i32_1 = arith.constant 0 : i32
    return %c0_i32, %c0_i32_0 : i32, i32
  }
  func.func @transform_4(%arg0: i32, %arg1: i32) -> (i32, i32) {
    %c0_i32 = arith.constant 0 : i32
    %c0_i32_0 = arith.constant 0 : i32
    %c0_i32_1 = arith.constant 0 : i32
    return %c0_i32, %c0_i32_0 : i32, i32
  }
  func.func @transform_5(%arg0: i32, %arg1: i32) -> (i32, i32, i32) {
    %c0_i32 = arith.constant 0 : i32
    %c0_i32_0 = arith.constant 0 : i32
    return %arg0, %arg1, %c0_i32 : i32, i32, i32
  }
}

</mosaic_0001>

<bundles_post_ra>
// kernel: tpu_custom_call.1
= control target key start
LH: loop header
LB: loop body
LE: loop exit
PB: predicated region body
PF: predicated region fallthrough
CT: control target
= control target key end

     0   :  { %10 = vsyncpa [#allocation4], 0  ;;  %s1507_s0 = inlined_call_operand.hbm [shape: f32[2,8,128], index: 0, kind: input, shape index: {}]   ;;  %s1508_s1 = inlined_call_operand.hbm [shape: f32[128,128], index: 1, kind: input, shape index: {}]   ;;  %s1509_s2 = inlined_call_operand.vmem [shape: f32[1,128], index: 2, kind: input, shape index: {}]   ;;  %s1510_s3 = inlined_call_operand.hbm [shape: f32[128,256], index: 3, kind: input, shape index: {}]   ;;  %s1511_s4 = inlined_call_operand.vmem [shape: f32[1,256], index: 4, kind: input, shape index: {}]   ;;  %s1512_s5 = inlined_call_operand.hbm [shape: f32[2,8,128], index: 5, kind: output, shape index: {}]  }
   0x1   :  { %12 = vsyncpa [#allocation4 + $0x1], 0 }
   0x2   :  { %13 = vsyncpa [#allocation7], 0 }
   0x3   :  { %14 = vsyncpa [#allocation5], 0 }
   0x4   :  { %16 = vsyncpa [#allocation5 + $0x1], 0  ;;  %s1227_s18 = smov 0   ;;  %s1229_s19 = smov 0  }
   0x5   :  { %s1231_s20 = smov 0   ;;  %s1233_s21 = smov 0  }
   0x6   :  { %s1235_s22 = smov 0   ;;  %s1237_s23 = smov 0  }
   0x7 LB: > { %s777_s24 = sadd.s32 4294967295, %s1184_s23   ;;  %s778_s25 = sadd.s32 4294967294, %s1184_s23   ;;  %s1184_s23 = sphi %s1237_s23, %s22_s23   ;;  %s1180_s22 = sphi %s1235_s22, %s1534_s22   ;;  %s1176_s21 = sphi %s1233_s21, %s1533_s21   ;;  %s1172_s20 = sphi %s1231_s20, %s1532_s20   ;;  %s1168_s19 = sphi %s1229_s19, %s1531_s19   ;;  %s1164_s18 = sphi %s1227_s18, %s1530_s18  }
   0x8   : > { %p54_p0 = scmp.ne.s32.totalorder %s1168_s19, %s1164_s18  ;;  %p1261_p1 = scmp.eq.s32.totalorder %s777_s24, 0 }
   0x9   : > { %p1265_p2 = scmp.eq.s32.totalorder %s777_s24, 1  ;;  %p170_p3 = scmp.eq.s32.totalorder %s778_s25, 1 }
   0xa   : > { %s1517_s26 = scalar_select %p1261_p1, 1, 0 }
   0xb   : > { %p1271_p4 = por %p1261_p1, %p54_p0  ;;  %p779_p5 = scmp.ge.s32.totalorder %s1184_s23, 1 }
   0xc   : > { %p1276_p6 = por %p170_p3, %p54_p0  ;;  %p177_p7 = scmp.lt.s32.totalorder %s1184_s23, 3 }
   0xd   : > { %s1519_s28 = scalar_select %p1271_p4, 1, 0 }
   0xe   : > { %s1520_s29 = scalar_select %p1276_p6, 1, 0 }
   0xf   : > { %p1281_p8 = pnand %p779_p5, %p177_p7  ;;  %s1186_s6 = smov [#allocation6]  }
  0x10   : > { %s189_s7 = sshll.u32 %s1186_s6, 4  ;;  %s1187_s9 = smov [#allocation8]   ;;  %s1285_s7 = int_to_ptr.vmem [resolvable:$true] %s189_s7 }
  0x11   : > { %p930_p9 = pneg %p1281_p8  ;;  %s205_s10 = sshll.u32 %s1187_s9, 4  ;;  %s1296_s10 = int_to_ptr.vmem [resolvable:$true] %s205_s10 }
  0x12   : > { %s1012_s13 = scalar_lea.hbm %s1508_s1, 2048 }
  0x13   : > { %p1292_p11 = pnand %p930_p9, %p1261_p1  ;;  %p1013_p12 = scmp.ne.s32.totalorder %s1508_s1, %s1012_s13 }
  0x14   : > { %p1019_p5 = scmp.lt.u32.totalorder %s1012_s13, %s1508_s1 }
  0x15   : > { %p1014_p13 = pneg %p1292_p11 }
  0x17   : > { %p1015_p0 = pnand %p1014_p13, %p1013_p12 }
  0x19   : > { %p1016_p3 = pneg %p1015_p0 }
  0x1b   : > { %p1021_p7 = pnand %p1019_p5, %p1016_p3 }
  0x1d   : > { %1024 = shalt.err (!%p1021_p7)
}
  0x1e   : > { %s1025_s24 = scalar_lea.vmem %s1285_s7, 2048  ;;  %p1033_p1 = scmp.lt.s32.totalorder %s1285_s7, %s1285_s7 }
  0x1f   : > { %p1026_p9 = scmp.ne.s32.totalorder %s1285_s7, %s1025_s24  ;;  %p1034_p12 = scmp.lt.s32.totalorder %s1025_s24, %s1025_s24 }
  0x21   : > { %p1028_p10 = pnand %p1026_p9, %p1014_p13  ;;  %p1035_p0 = por %p1034_p12, %p1033_p1 }
  0x23   : > { %p1029_p6 = pneg %p1028_p10 }
  0x25   : > { %p1036_p4 = pnand %p1035_p0, %p1029_p6 }
  0x27   : > { %1039 = shalt.err (!%p1036_p4)
}
  0x28   : > { %s1188_s25 = smov 128   ;;  %s1189_s6 = smov 8  }
  0x29   : > { %933 = dma.hbm_to_vmem [thread:$0]  (!%p1292_p11), %s1508_s1, 2048, %s1285_s7, [#allocation7], %s1188_s25, %s1188_s25, %s1189_s6  }
  0x2a   : > { %s1040_s14 = scalar_lea.hbm %s1510_s3, 4096 }
  0x2b   : > { %p1041_p1 = scmp.ne.s32.totalorder %s1510_s3, %s1040_s14  ;;  %p1047_p10 = scmp.lt.u32.totalorder %s1040_s14, %s1510_s3 }
  0x2d   : > { %p1043_p4 = pnand %p1041_p1, %p1014_p13 }
  0x2f   : > { %p1044_p6 = pneg %p1043_p4 }
  0x31   : > { %p1049_p3 = pnand %p1047_p10, %p1044_p6 }
  0x33   : > { %1052 = shalt.err (!%p1049_p3)
}
  0x34   : > { %s1053_s7 = scalar_lea.vmem %s1296_s10, 4096  ;;  %p1061_p12 = scmp.lt.s32.totalorder %s1296_s10, %s1296_s10 }
  0x35   : > { %p1054_p5 = scmp.ne.s32.totalorder %s1296_s10, %s1053_s7  ;;  %p1062_p0 = scmp.lt.s32.totalorder %s1053_s7, %s1053_s7 }
  0x37   : > { %p1056_p7 = pnand %p1054_p5, %p1014_p13  ;;  %p1063_p1 = por %p1062_p0, %p1061_p12 }
  0x39   : > { %p1057_p9 = pneg %p1056_p7 }
  0x3b   : > { %p1064_p4 = pnand %p1063_p1, %p1057_p9 }
  0x3d   : > { %1067 = shalt.err (!%p1064_p4)
}
  0x3e   : > { %s1190_s25 = smov 256   ;;  %s1191_s6 = smov 16  }
  0x3f   : > { %936 = dma.hbm_to_vmem [thread:$0]  (!%p1292_p11), %s1510_s3, 4096, %s1296_s10, [#allocation7], %s1190_s25, %s1190_s25, %s1191_s6  }
  0x40   : > { %s34_s12 = sadd.s32 1, %s1180_s22  ;;  %s41_s13 = sadd.s32 1, %s1172_s20 }
  0x41   : > { %p36_p13 = scmp.ge.s32.totalorder %s34_s12, 2  ;;  %p48_p6 = scmp.ne.s32.totalorder %s1172_s20, %s1168_s19 }
  0x42   : > { %p49_p10 = scmp.eq.s32.totalorder %s1184_s23, 0  ;;  %p947_p3 = scmp.lt.s32.totalorder %s1184_s23, 2 }
  0x43   : > { %s1536_s12 = smov (%p36_p13, %s34_s12), 0  ;;  %p1360_p7 = por %p1265_p2, %p48_p6 }
  0x44   : > { %p50_p5 = por %p49_p10, %p48_p6  ;;  %s38_s8 = ssub.s32 %s1180_s22, %s1536_s12 }
  0x45   : > { %s1523_s14 = scalar_select %p1360_p7, 1, 0 }
  0x46   : > { %s222_s15 = sand.u32 1, %s1172_s20   ;;  %p39_p9 = scmp.eq.s32.totalorder %s38_s8, 0 }
  0x47   : > { %s783_s10 = sshll.u32 %s222_s15, 3  ;;  %s784_s16 = sshll.u32 %s1180_s22, 7 }
  0x48   : > { %s1369_s17 = scalar_select %p39_p9, %s1172_s20, %s41_s13  }
  0x49   : > { %s1374_s25 = scalar_lea.hbm %s1507_s0, %s784_s16  ;;  %s226_s27 = scalar_lea.vmem [#allocation3], %s783_s10 }
  0x4a   : > { %s233_s6 = sshll.u32 %s226_s27, 4  ;;  %p1378_p2 = pnand %p947_p3, %p50_p5  ;;  %s1382_s6 = int_to_ptr.vmem [resolvable:$true] %s233_s6 }
  0x4b   : > { %s223_s11 = scalar_lea.sflag [#allocation4], %s222_s15  ;;  %s1068_s13 = scalar_lea.hbm %s1374_s25, 128 }
  0x4c   : > { %p1069_p11 = scmp.ne.s32.totalorder %s1374_s25, %s1068_s13  ;;  %p1070_p12 = pneg %p1378_p2 }
  0x4d   : > { %s1073_s16 = scalar_lea.hbm %s1507_s0, 256  ;;  %p1074_p4 = scmp.lt.u32.totalorder %s1374_s25, %s1507_s0 }
  0x4e   : > { %p1071_p0 = pnand %p1070_p12, %p1069_p11  ;;  %p1075_p13 = scmp.lt.u32.totalorder %s1073_s16, %s1068_s13 }
  0x4f   : > { %p1077_p10 = scmp.lt.u32.totalorder %s1068_s13, %s1374_s25 }
  0x50   : > { %p1072_p1 = pneg %p1071_p0  ;;  %p1076_p6 = por %p1075_p13, %p1074_p4 }
  0x52   : > { %p1078_p3 = por %p1077_p10, %p1076_p6 }
  0x54   : > { %p1079_p5 = pnand %p1078_p3, %p1072_p1 }
  0x56   : > { %1082 = shalt.err (!%p1079_p5)
}
  0x57   : > { %s1083_s15 = scalar_lea.vmem %s1382_s6, 128  ;;  %s1192_s27 = smov [#allocation3]  }
  0x58   : > { %p1084_p9 = scmp.ne.s32.totalorder %s1382_s6, %s1083_s15  ;;  %s1088_s8 = sshll.u32 %s1192_s27, 4  ;;  %s1089_s8 = int_to_ptr.vmem [resolvable:$false] %s1088_s8 }
  0x59   : > { %s1090_s10 = scalar_lea.vmem %s1089_s8, 256  ;;  %p1091_p7 = scmp.lt.s32.totalorder %s1382_s6, %s1089_s8 }
  0x5a   : > { %p1086_p11 = pnand %p1084_p9, %p1070_p12  ;;  %p1092_p4 = scmp.lt.s32.totalorder %s1090_s10, %s1083_s15 }
  0x5c   : > { %p1087_p0 = pneg %p1086_p11  ;;  %p1093_p13 = por %p1092_p4, %p1091_p7 }
  0x5e   : > { %p1094_p6 = pnand %p1093_p13, %p1087_p0 }
  0x60   : > { %1097 = shalt.err (!%p1094_p6)
}
  0x61   : > { %940 = dma.hbm_to_vmem [thread:$0]  (!%p1378_p2), %s1374_s25, 128, %s1382_s6, %s223_s11  }
  0x62   : > { %242 = sbr.rel (%p1281_p8) target bundleno = 960 (0x3c0), region = 40  ;;  %s1412_s13 = sand.u32 (!%p1281_p8), 1, %s1168_s19  }
  0x63   : > { %s786_s16 = sshll.u32 (!%p1281_p8), %s1412_s13, 3  ;;  %s245_s24 = scalar_lea.sflag (!%p1281_p8), [#allocation4], %s1412_s13 }
  0x64   : > { %s1418_s7 = scalar_lea.vmem (!%p1281_p8), [#allocation3], %s786_s16  ;;  %p1525_p7 = scmp.ne.s32.totalorder (!%p1281_p8), %s1519_s28, 0 }
  0x69   : > { %1151 = dma.done.wait (%p1525_p7), %s245_s24, 128  }
  0x6a   : > { %1153 = vsyncadd (%p1525_p7), %s245_s24, 4294967168  ;;  %p1526_p2 = scmp.ne.s32.totalorder %s1517_s26, 0 }
  0x6c   : > { %1155 = dma.done.wait (%p1526_p2), [#allocation7], 6144  }
  0x6d   : > { %1157 = vsyncadd (%p1526_p2), [#allocation7], 4294961152  ;;  %v1193_v0 = vmov 0.0|0.0   ;;  %v1194_v1 = vmov 0.0   ;;  %vm1195_vm0 = vmmov 0   ;;  %v289_v2 = vld [vmem:[#allocation8 + $0x8] sm:$0xff] }
  0x6e   : > { %894 = vmatprep.subr.bf16.mxu1 %v1193_v0  ;;  %396 = vmatprep.mubr.f32.mxu0 %v1194_v1  ;;  %v291_v3 = vld [vmem:[#allocation8 + $0x18] sm:$0xff]  ;;  %v288_v4 = vld [vmem:[#allocation8] sm:$0xff]  ;;  %v290_v6 = vld [vmem:[#allocation8 + $0x10] sm:$0xff]  ;;  %vm573_vm1 = vcmask 64512   ;;  %s793_s6 = sshll.u32 %s1176_s21, 7  ;;  %s282_s9 = scalar_lea.vmem [#allocation9], %s786_s16 }
  0x6f   : > { %849 = vmatprep.mubr.msk.f32.mxu1 %vm1195_vm0, %v1194_v1  ;;  %v862_v5 = vpack.c.bf16 %v291_v3, %v289_v2  ;;  %v293_v7 = vld [vmem:[#allocation8 + $0x28] sm:$0xff]  ;;  %v295_v8 = vld [vmem:[#allocation8 + $0x38] sm:$0xff]  ;;  %v864_v9 = vpack.c.bf16 %v290_v6, %v288_v4  ;;  %v408_v11 = vld [vmem:[#allocation6] sm:$0xff]  ;;  %s677_s11 = sshll.u32 %s282_s9, 4  ;;  %s1458_s8 = scalar_lea.hbm %s1512_s5, %s793_s6  ;;  %s1460_s11 = int_to_ptr.vmem [resolvable:$true] %s677_s11 }
  0x70   : > { %v866_v10 = vpack.c.bf16 %v295_v8, %v293_v7  ;;  %v409_v12 = vld [vmem:[#allocation6 + $0x8] sm:$0xff]  ;;  %v292_v13 = vld [vmem:[#allocation8 + $0x20] sm:$0xff]  ;;  %v294_v15 = vld [vmem:[#allocation8 + $0x30] sm:$0xff]  ;;  %s663_s10 = scalar_lea.sflag [#allocation5], %s1412_s13  ;;  %s1098_s21 = scalar_lea.vmem %s1460_s11, 128 }
  0x71   : > { %863 = vmatprep.subr.bf16.mxu0 %v862_v5  ;;  %v895_v14 = vpack.c.bf16 %v409_v12, %v408_v11  ;;  %v297_v16 = vld [vmem:[#allocation8 + $0x48] sm:$0xff]  ;;  %v299_v17 = vld [vmem:[#allocation8 + $0x58] sm:$0xff]  ;;  %v868_v18 = vpack.c.bf16 %v294_v15, %v292_v13  ;;  %v410_v19 = vld [vmem:[#allocation6 + $0x10] sm:$0xff]  ;;  %v322_v13 = vlaneseq  ;;  %p1099_p8 = scmp.ne.s32.totalorder %s1460_s11, %s1098_s21  ;;  %p1527_p12 = scmp.ne.s32.totalorder %s1523_s14, 0 }
  0x72   : > { %865 = vmatpush1.bf16.msra.mxu0 %v864_v9  ;;  %v411_v20 = vld [vmem:[#allocation6 + $0x18] sm:$0xff]  ;;  %v870_v21 = vpack.c.bf16 %v299_v17, %v297_v16  ;;  %v296_v23 = vld [vmem:[#allocation8 + $0x40] sm:$0xff]  ;;  %v298_v24 = vld [vmem:[#allocation8 + $0x50] sm:$0xff]  ;;  %s1196_s16 = smov [#allocation9]  }
  0x73   : > { %867 = vmatprep.subr.bf16.mxu0 %v866_v10  ;;  %896 = vmatpush3.bf16.msra.mxu1 %v895_v14  ;;  %v898_v22 = vpack.c.bf16 %v411_v20, %v410_v19  ;;  %v301_v25 = vld [vmem:[#allocation8 + $0x68] sm:$0xff]  ;;  %v303_v26 = vld [vmem:[#allocation8 + $0x78] sm:$0xff]  ;;  %v412_v27 = vld [vmem:[#allocation6 + $0x20] sm:$0xff]  ;;  %v872_v29 = vpack.c.bf16 %v298_v24, %v296_v23  ;;  %v323_v14 = vshrl.u32 %v322_v13, 7  ;;  %p1100_p1 = pnand %p1099_p8, %p1527_p12  ;;  %s1102_s24 = sshll.u32 %s1196_s16, 4  ;;  %s1103_s24 = int_to_ptr.vmem [resolvable:$false] %s1102_s24 }
  0x74   : > { %897 = vmatprep.subr.bf16.mxu1 %v1193_v0  ;;  %v413_v28 = vld [vmem:[#allocation6 + $0x28] sm:$0xff]  ;;  %v874_v30 = vpack.c.bf16 %v303_v26, %v301_v25  ;;  %v300_v32 = vld [vmem:[#allocation8 + $0x60] sm:$0xff]  ;;  %v302_v33 = vld [vmem:[#allocation8 + $0x70] sm:$0xff]  ;;  %p1105_p3 = scmp.lt.s32.totalorder %s1460_s11, %s1103_s24 }
  0x75   : > { %v901_v31 = vpack.c.bf16 %v413_v28, %v412_v27  ;;  %v305_v34 = vld [vmem:[#allocation8 + $0x88] sm:$0xff]  ;;  %v307_v35 = vld [vmem:[#allocation8 + $0x98] sm:$0xff]  ;;  %v414_v36 = vld [vmem:[#allocation6 + $0x30] sm:$0xff]  ;;  %v876_v38 = vpack.c.bf16 %v302_v33, %v300_v32  ;;  %v324_v15 = vsub.s32 0, %v323_v14  ;;  %v328_v16 = vsub.s32 1, %v323_v14  ;;  %p1101_p10 = pneg %p1100_p1 }
  0x76   : > { %869 = vmatpush1.bf16.msra.mxu0 %v868_v18  ;;  %v415_v37 = vld [vmem:[#allocation6 + $0x38] sm:$0xff]  ;;  %v878_v39 = vpack.c.bf16 %v307_v35, %v305_v34  ;;  %v304_v41 = vld [vmem:[#allocation8 + $0x80] sm:$0xff]  ;;  %v306_v42 = vld [vmem:[#allocation8 + $0x90] sm:$0xff] }
  0x77   : > { %871 = vmatprep.subr.bf16.mxu0 %v870_v21  ;;  %899 = vmatpush3.bf16.msra.mxu1 %v898_v22  ;;  %v904_v40 = vpack.c.bf16 %v415_v37, %v414_v36  ;;  %v309_v43 = vld [vmem:[#allocation8 + $0xa8] sm:$0xff]  ;;  %v311_v44 = vld [vmem:[#allocation8 + $0xb8] sm:$0xff]  ;;  %v416_v45 = vld [vmem:[#allocation6 + $0x40] sm:$0xff]  ;;  %v880_v47 = vpack.c.bf16 %v306_v42, %v304_v41 }
  0x78   : > { %900 = vmatprep.subr.bf16.mxu1 %v1193_v0  ;;  %v417_v46 = vld [vmem:[#allocation6 + $0x48] sm:$0xff]  ;;  %v882_v48 = vpack.c.bf16 %v311_v44, %v309_v43  ;;  %v308_v50 = vld [vmem:[#allocation8 + $0xa0] sm:$0xff]  ;;  %v310_v51 = vld [vmem:[#allocation8 + $0xb0] sm:$0xff] }
  0x79   : > { %v907_v49 = vpack.c.bf16 %v417_v46, %v416_v45  ;;  %v313_v52 = vld [vmem:[#allocation8 + $0xc8] sm:$0xff]  ;;  %v315_v53 = vld [vmem:[#allocation8 + $0xd8] sm:$0xff]  ;;  %v418_v54 = vld [vmem:[#allocation6 + $0x50] sm:$0xff]  ;;  %v884_v56 = vpack.c.bf16 %v310_v51, %v308_v50 }
  0x7a   : > { %873 = vmatpush1.bf16.msra.mxu0 %v872_v29  ;;  %v419_v55 = vld [vmem:[#allocation6 + $0x58] sm:$0xff]  ;;  %v886_v57 = vpack.c.bf16 %v315_v53, %v313_v52  ;;  %v312_v59 = vld [vmem:[#allocation8 + $0xc0] sm:$0xff]  ;;  %v314_v60 = vld [vmem:[#allocation8 + $0xd0] sm:$0xff] }
  0x7b   : > { %875 = vmatprep.subr.bf16.mxu0 %v874_v30  ;;  %902 = vmatpush3.bf16.msra.mxu1 %v901_v31  ;;  %v910_v58 = vpack.c.bf16 %v419_v55, %v418_v54  ;;  %v317_v61 = vld [vmem:[#allocation8 + $0xe8] sm:$0xff]  ;;  %v319_v62 = vld [vmem:[#allocation8 + $0xf8] sm:$0xff]  ;;  %v420_v63 = vld [vmem:[#allocation6 + $0x60] sm:$0xff]  ;;  %v888_v3 = vpack.c.bf16 %v314_v60, %v312_v59 }
  0x7c   : > { %903 = vmatprep.subr.bf16.mxu1 %v1193_v0  ;;  %v421_v2 = vld [vmem:[#allocation6 + $0x68] sm:$0xff]  ;;  %v890_v4 = vpack.c.bf16 %v319_v62, %v317_v61  ;;  %v316_v6 = vld [vmem:[#allocation8 + $0xe0] sm:$0xff]  ;;  %v318_v7 = vld [vmem:[#allocation8 + $0xf0] sm:$0xff] }
  0x7d   : > { %v913_v5 = vpack.c.bf16 %v421_v2, %v420_v63  ;;  %v422_v8 = vld [vmem:[#allocation6 + $0x70] sm:$0xff]  ;;  %v423_v9 = vld [vmem:[#allocation6 + $0x78] sm:$0xff]  ;;  %v892_v10 = vpack.c.bf16 %v318_v7, %v316_v6 }
  0x7e   : > { %877 = vmatpush1.bf16.msra.mxu0 %v876_v38  ;;  %v916_v11 = vpack.c.bf16 %v423_v9, %v422_v8  ;;  %v287_v12 = vld [vmem:[%s1418_s7] sm:$0xff]  ;;  %s1104_s7 = scalar_lea.vmem %s1103_s24, 256 }
  0x7f   : > { %879 = vmatprep.subr.bf16.mxu0 %v878_v39  ;;  %905 = vmatpush3.bf16.msra.mxu1 %v904_v40  ;;  %v790_v19 = vld [vmem:[%s1509_s2] ss:$0 sm:$0xff]  ;;  %p1106_p5 = scmp.lt.s32.totalorder %s1104_s7, %s1098_s21 }
  0x80   : > { %906 = vmatprep.subr.bf16.mxu1 %v1193_v0 }
  0x81   : > { %p1107_p9 = por %p1106_p5, %p1105_p3 }
  0x82   : > { %881 = vmatpush1.bf16.msra.mxu0 %v880_v47 }
  0x83   : > { %883 = vmatprep.subr.bf16.mxu0 %v882_v48  ;;  %908 = vmatpush3.bf16.msra.mxu1 %v907_v49  ;;  %p1108_p11 = pnand %p1107_p9, %p1101_p10 }
  0x84   : > { %909 = vmatprep.subr.bf16.mxu1 %v1193_v0 }
  0x86   : > { %885 = vmatpush1.bf16.msra.mxu0 %v884_v56 }
  0x87   : > { %887 = vmatprep.subr.bf16.mxu0 %v886_v57  ;;  %911 = vmatpush3.bf16.msra.mxu1 %v910_v58 }
  0x88   : > { %912 = vmatprep.subr.bf16.mxu1 %v1193_v0 }
  0x8a   : > { %889 = vmatpush1.bf16.msra.mxu0 %v888_v3 }
  0x8b   : > { %891 = vmatprep.subr.bf16.mxu0 %v890_v4  ;;  %914 = vmatpush3.bf16.msra.mxu1 %v913_v5 }
  0x8c   : > { %915 = vmatprep.subr.bf16.mxu1 %v1193_v0  ;;  %v320_v0 = vld [vmem:[%s1511_s4] sm:$0x3] }
  0x8d   : > { %v325_v17 = vrot.slane %v320_v0, %v324_v15  ;;  %v329_v18 = vrot.slane %v320_v0, %v328_v16 }
  0x8e   : > { %893 = vmatpush1.bf16.msra.mxu0 %v892_v10 }
  0x8f   : > { %917 = vmatpush3.bf16.msra.mxu1 %v916_v11  ;;  %852 = vmatprep.subr.mxu0 %v1194_v1 }
  0x90   : > { %857 = vmatprep.subr.mxu1 %v1194_v1 }
  0x91   : > { %397 = vmatmul.mubr.f32.vlgmr.msra.gmra.mrb[0].mxu0 %v287_v12 }
  0x92   : > { %850 = vmatmul.mubr.f32.vlgmr.msra.gmra.mrb[0].mxu1 %v287_v12  ;;  %854 = vmatprep.mubr.msk.f32.mxu0 %vm1195_vm0, %v1194_v1 }
  0x93   : > { %859 = vmatprep.mubr.msk.f32.mxu1 %vm1195_vm0, %v1194_v1 }
 0x164   : > { %v398_v20 = vpop.f32.mrb[0].mxu0 }
 0x165   : > { %v399_v21 = vadd.f32 %v398_v20, %v325_v17  ;;  %v400_v22 = vpop.f32.mrb[1].mxu0  ;;  %v497_v23 = vpop.f32.mrb[0].mxu1 }
 0x166   : > { %v401_v24 = vadd.f32 %v400_v22, %v329_v18  ;;  %v498_v1 = vadd.f32 %v790_v19, %v497_v23  ;;  %v851_v25 = vpop.f32.mrb[1].mxu1 }
 0x167   : > { %853 = vmatpush3.xpose.msra.mxu0 %v399_v21 }
 0x168   : > { %858 = vmatpush3.msra.mxu1 %v401_v24 }
 0x16a   : > { %855 = vmatmul.mubr.f32.vlgmr.msra.gmra.mrb[2].mxu0 %v498_v1 }
 0x23d   : > { %v569_v26 = vpop.f32.mrb[2].mxu0 }
 0x23e   : > { %v856_v27 = vpop.f32.mrb[3].mxu0  ;;  %v574_v28 = vsel %vm573_vm1, %v569_v26, -inf }
 0x23f   : > { %575 = vmax.xlane.f32.xlu0 %v574_v28 }
 0x2cc   : > { %v576_v29 = vpop.xlane.xlu0 %575 }
 0x2cd   : > { %v577_v30 = vsub.f32 %v569_v26, %v576_v29 }
 0x2cf   : > { %v578_v31 = vmul.f32 1.442695, %v577_v30 }
 0x2d1   : > { %1008 = vpow2.f32 %v578_v31 }
 0x2db   : > { %v1009_v32 = vpop.eup %1008 }
 0x2dc   : > { %860 = vmatmul.mubr.msk.f32.vlgmr.msra.gmra.mrb[2].mxu1 %vm573_vm1, %v1009_v32  ;;  %v580_v33 = vsel %vm573_vm1, %v1009_v32, 0.0 }
 0x2dd   : > { %581 = vadd.xlane.f32.xlu0 %v580_v33 }
 0x36a   : > { %v582_v34 = vpop.xlane.xlu0 %581 }
 0x36b   : > { %1010 = vrcp.f32 %v582_v34 }
 0x375   : > { %v1011_v35 = vpop.eup %1010 }
 0x376   : > { %v657_v36 = vmul.f32 %v1011_v35, %v582_v34 }
 0x378   : > { %v658_v37 = vsub.f32 2.0, %v657_v36 }
 0x37a   : > { %v659_v38 = vmul.f32 %v1011_v35, %v658_v37 }
 0x3af   : > { %v652_v39 = vpop.f32.mrb[2].mxu1 }
 0x3b0   : > { %v660_v40 = vmul.f32 %v659_v38, %v652_v39  ;;  %v861_v41 = vpop.f32.mrb[3].mxu1 }
 0x3b2   : > { %661 = vst [vmem:[%s282_s9] sm:$0xff] %v660_v40 }
 0x3b3   : > { %1111 = shalt.err (!%p1108_p11)
}
 0x3b4   : > { %s1112_s13 = scalar_lea.hbm %s1458_s8, 128  ;;  %s1116_s30 = scalar_lea.hbm %s1512_s5, 256 }
 0x3b5   : > { %p1113_p0 = scmp.ne.s32.totalorder %s1458_s8, %s1112_s13  ;;  %p1117_p6 = scmp.lt.u32.totalorder %s1458_s8, %s1512_s5 }
 0x3b6   : > { %p1118_p7 = scmp.lt.u32.totalorder %s1116_s30, %s1112_s13  ;;  %p1120_p8 = scmp.lt.u32.totalorder %s1112_s13, %s1458_s8 }
 0x3b7   : > { %p1114_p4 = pnand %p1113_p0, %p1527_p12 }
 0x3b8   : > { %p1119_p2 = por %p1118_p7, %p1117_p6 }
 0x3b9   : > { %p1115_p13 = pneg %p1114_p4 }
 0x3ba   : > { %p1121_p1 = por %p1120_p8, %p1119_p2 }
 0x3bc   : > { %p1122_p10 = pnand %p1121_p1, %p1115_p13 }
 0x3be   : > { %1125 = shalt.err (!%p1122_p10)
}
 0x3bf   : > { %928 = dma.vmem_to_hbm [thread:$0]  (%p1527_p12), %s1460_s11, 128, %s1458_s8, %s663_s10  }
 0x3c0 PF: > { %s689_s9 = sand.u32 1, %s1164_s18   ;;  %p1528_p3 = scmp.ne.s32.totalorder %s1520_s29, 0 }
 0x3c1   : > { %p1529_p5 = scmp.ge.s32.totalorder %s1184_s23, 2  ;;  %s690_s15 = scalar_lea.sflag [#allocation5], %s689_s9 }
 0x3c3   : > { %p942_p9 = pnand %p1529_p5, %p1528_p3 }
 0x3c5   : > { %1159 = dma.done.wait (!%p942_p9), %s690_s15, 128  }
 0x3c6   : > { %1161 = vsyncadd (!%p942_p9), %s690_s15, 4294967168  ;;  %s22_s23 = sadd.s32 1, %s1184_s23   ;;  %s1530_s18 = smov %s1168_s19 }
 0x3c7   : > { %p19_p11 = scmp.ge.s32.totalorder %s22_s23, 4   ;;  %s1531_s19 = smov %s1172_s20 }
 0x3c8   : > { %s1532_s20 = smov %s1369_s17  ;;  %s1533_s21 = smov %s1180_s22 }
 0x3c9   : > { %s1534_s22 = smov %s1536_s12  ;;  %21 = sbr.rel (!%p19_p11) target bundleno = 7 (0x7), region = 98 }
 0x3d0   :  { %695 = vsyncpa [#allocation4], 1 }
 0x3d1   :  { %697 = vsyncpa [#allocation4 + $0x1], 1 }
 0x3d2   :  { %698 = vsyncpa [#allocation7], 1 }
 0x3d3   :  { %699 = vsyncpa [#allocation5], 1 }
 0x3d4   :  { %701 = vsyncpa [#allocation5 + $0x1], 1 }

// kernel: tpu_custom_call.1
= control target key start
LH: loop header
LB: loop body
LE: loop exit
PB: predicated region body
PF: predicated region fallthrough
CT: control target
= control target key end

     0   :  { %10 = vsyncpa [#allocation4], 0  ;;  %s1507_s0 = inlined_call_operand.hbm [shape: f32[2,8,128], index: 0, kind: input, shape index: {}]   ;;  %s1508_s1 = inlined_call_operand.hbm [shape: f32[128,128], index: 1, kind: input, shape index: {}]   ;;  %s1509_s2 = inlined_call_operand.vmem [shape: f32[1,128], index: 2, kind: input, shape index: {}]   ;;  %s1510_s3 = inlined_call_operand.hbm [shape: f32[128,256], index: 3, kind: input, shape index: {}]   ;;  %s1511_s4 = inlined_call_operand.vmem [shape: f32[1,256], index: 4, kind: input, shape index: {}]   ;;  %s1512_s5 = inlined_call_operand.hbm [shape: f32[2,8,128], index: 5, kind: output, shape index: {}]  }
   0x1   :  { %12 = vsyncpa [#allocation4 + $0x1], 0 }
   0x2   :  { %13 = vsyncpa [#allocation7], 0 }
   0x3   :  { %14 = vsyncpa [#allocation5], 0 }
   0x4   :  { %16 = vsyncpa [#allocation5 + $0x1], 0  ;;  %s1227_s18 = smov 0   ;;  %s1229_s19 = smov 0  }
   0x5   :  { %s1231_s20 = smov 0   ;;  %s1233_s21 = smov 0  }
   0x6   :  { %s1235_s22 = smov 0   ;;  %s1237_s23 = smov 0  }
   0x7 LB: > { %s777_s24 = sadd.s32 4294967295, %s1184_s23   ;;  %s778_s25 = sadd.s32 4294967294, %s1184_s23   ;;  %s1184_s23 = sphi %s1237_s23, %s22_s23   ;;  %s1180_s22 = sphi %s1235_s22, %s1534_s22   ;;  %s1176_s21 = sphi %s1233_s21, %s1533_s21   ;;  %s1172_s20 = sphi %s1231_s20, %s1532_s20   ;;  %s1168_s19 = sphi %s1229_s19, %s1531_s19   ;;  %s1164_s18 = sphi %s1227_s18, %s1530_s18  }
   0x8   : > { %p54_p0 = scmp.ne.s32.totalorder %s1168_s19, %s1164_s18  ;;  %p1261_p1 = scmp.eq.s32.totalorder %s777_s24, 0 }
   0x9   : > { %p1265_p2 = scmp.eq.s32.totalorder %s777_s24, 1  ;;  %p170_p3 = scmp.eq.s32.totalorder %s778_s25, 1 }
   0xa   : > { %s1517_s26 = scalar_select %p1261_p1, 1, 0 }
   0xb   : > { %p1271_p4 = por %p1261_p1, %p54_p0  ;;  %p779_p5 = scmp.ge.s32.totalorder %s1184_s23, 1 }
   0xc   : > { %p1276_p6 = por %p170_p3, %p54_p0  ;;  %p177_p7 = scmp.lt.s32.totalorder %s1184_s23, 3 }
   0xd   : > { %s1519_s28 = scalar_select %p1271_p4, 1, 0 }
   0xe   : > { %s1520_s29 = scalar_select %p1276_p6, 1, 0 }
   0xf   : > { %p1281_p8 = pnand %p779_p5, %p177_p7  ;;  %s1186_s6 = smov [#allocation6]  }
  0x10   : > { %s189_s7 = sshll.u32 %s1186_s6, 4  ;;  %s1187_s9 = smov [#allocation8]   ;;  %s1285_s7 = int_to_ptr.vmem [resolvable:$true] %s189_s7 }
  0x11   : > { %p930_p9 = pneg %p1281_p8  ;;  %s205_s10 = sshll.u32 %s1187_s9, 4  ;;  %s1296_s10 = int_to_ptr.vmem [resolvable:$true] %s205_s10 }
  0x12   : > { %s1012_s13 = scalar_lea.hbm %s1508_s1, 2048 }
  0x13   : > { %p1292_p11 = pnand %p930_p9, %p1261_p1  ;;  %p1013_p12 = scmp.ne.s32.totalorder %s1508_s1, %s1012_s13 }
  0x14   : > { %p1019_p5 = scmp.lt.u32.totalorder %s1012_s13, %s1508_s1 }
  0x15   : > { %p1014_p13 = pneg %p1292_p11 }
  0x17   : > { %p1015_p0 = pnand %p1014_p13, %p1013_p12 }
  0x19   : > { %p1016_p3 = pneg %p1015_p0 }
  0x1b   : > { %p1021_p7 = pnand %p1019_p5, %p1016_p3 }
  0x1d   : > { %1024 = shalt.err (!%p1021_p7)
}
  0x1e   : > { %s1025_s24 = scalar_lea.vmem %s1285_s7, 2048  ;;  %p1033_p1 = scmp.lt.s32.totalorder %s1285_s7, %s1285_s7 }
  0x1f   : > { %p1026_p9 = scmp.ne.s32.totalorder %s1285_s7, %s1025_s24  ;;  %p1034_p12 = scmp.lt.s32.totalorder %s1025_s24, %s1025_s24 }
  0x21   : > { %p1028_p10 = pnand %p1026_p9, %p1014_p13  ;;  %p1035_p0 = por %p1034_p12, %p1033_p1 }
  0x23   : > { %p1029_p6 = pneg %p1028_p10 }
  0x25   : > { %p1036_p4 = pnand %p1035_p0, %p1029_p6 }
  0x27   : > { %1039 = shalt.err (!%p1036_p4)
}
  0x28   : > { %s1188_s25 = smov 128   ;;  %s1189_s6 = smov 8  }
  0x29   : > { %933 = dma.hbm_to_vmem [thread:$0]  (!%p1292_p11), %s1508_s1, 2048, %s1285_s7, [#allocation7], %s1188_s25, %s1188_s25, %s1189_s6  }
  0x2a   : > { %s1040_s14 = scalar_lea.hbm %s1510_s3, 4096 }
  0x2b   : > { %p1041_p1 = scmp.ne.s32.totalorder %s1510_s3, %s1040_s14  ;;  %p1047_p10 = scmp.lt.u32.totalorder %s1040_s14, %s1510_s3 }
  0x2d   : > { %p1043_p4 = pnand %p1041_p1, %p1014_p13 }
  0x2f   : > { %p1044_p6 = pneg %p1043_p4 }
  0x31   : > { %p1049_p3 = pnand %p1047_p10, %p1044_p6 }
  0x33   : > { %1052 = shalt.err (!%p1049_p3)
}
  0x34   : > { %s1053_s7 = scalar_lea.vmem %s1296_s10, 4096  ;;  %p1061_p12 = scmp.lt.s32.totalorder %s1296_s10, %s1296_s10 }
  0x35   : > { %p1054_p5 = scmp.ne.s32.totalorder %s1296_s10, %s1053_s7  ;;  %p1062_p0 = scmp.lt.s32.totalorder %s1053_s7, %s1053_s7 }
  0x37   : > { %p1056_p7 = pnand %p1054_p5, %p1014_p13  ;;  %p1063_p1 = por %p1062_p0, %p1061_p12 }
  0x39   : > { %p1057_p9 = pneg %p1056_p7 }
  0x3b   : > { %p1064_p4 = pnand %p1063_p1, %p1057_p9 }
  0x3d   : > { %1067 = shalt.err (!%p1064_p4)
}
  0x3e   : > { %s1190_s25 = smov 256   ;;  %s1191_s6 = smov 16  }
  0x3f   : > { %936 = dma.hbm_to_vmem [thread:$0]  (!%p1292_p11), %s1510_s3, 4096, %s1296_s10, [#allocation7], %s1190_s25, %s1190_s25, %s1191_s6  }
  0x40   : > { %s34_s12 = sadd.s32 1, %s1180_s22  ;;  %s41_s13 = sadd.s32 1, %s1172_s20 }
  0x41   : > { %p36_p13 = scmp.ge.s32.totalorder %s34_s12, 2  ;;  %p48_p6 = scmp.ne.s32.totalorder %s1172_s20, %s1168_s19 }
  0x42   : > { %p49_p10 = scmp.eq.s32.totalorder %s1184_s23, 0  ;;  %p947_p3 = scmp.lt.s32.totalorder %s1184_s23, 2 }
  0x43   : > { %s1536_s12 = smov (%p36_p13, %s34_s12), 0  ;;  %p1360_p7 = por %p1265_p2, %p48_p6 }
  0x44   : > { %p50_p5 = por %p49_p10, %p48_p6  ;;  %s38_s8 = ssub.s32 %s1180_s22, %s1536_s12 }
  0x45   : > { %s1523_s14 = scalar_select %p1360_p7, 1, 0 }
  0x46   : > { %s222_s15 = sand.u32 1, %s1172_s20   ;;  %p39_p9 = scmp.eq.s32.totalorder %s38_s8, 0 }
  0x47   : > { %s783_s10 = sshll.u32 %s222_s15, 3  ;;  %s784_s16 = sshll.u32 %s1180_s22, 7 }
  0x48   : > { %s1369_s17 = scalar_select %p39_p9, %s1172_s20, %s41_s13  }
  0x49   : > { %s1374_s25 = scalar_lea.hbm %s1507_s0, %s784_s16  ;;  %s226_s27 = scalar_lea.vmem [#allocation3], %s783_s10 }
  0x4a   : > { %s233_s6 = sshll.u32 %s226_s27, 4  ;;  %p1378_p2 = pnand %p947_p3, %p50_p5  ;;  %s1382_s6 = int_to_ptr.vmem [resolvable:$true] %s233_s6 }
  0x4b   : > { %s223_s11 = scalar_lea.sflag [#allocation4], %s222_s15  ;;  %s1068_s13 = scalar_lea.hbm %s1374_s25, 128 }
  0x4c   : > { %p1069_p11 = scmp.ne.s32.totalorder %s1374_s25, %s1068_s13  ;;  %p1070_p12 = pneg %p1378_p2 }
  0x4d   : > { %s1073_s16 = scalar_lea.hbm %s1507_s0, 256  ;;  %p1074_p4 = scmp.lt.u32.totalorder %s1374_s25, %s1507_s0 }
  0x4e   : > { %p1071_p0 = pnand %p1070_p12, %p1069_p11  ;;  %p1075_p13 = scmp.lt.u32.totalorder %s1073_s16, %s1068_s13 }
  0x4f   : > { %p1077_p10 = scmp.lt.u32.totalorder %s1068_s13, %s1374_s25 }
  0x50   : > { %p1072_p1 = pneg %p1071_p0  ;;  %p1076_p6 = por %p1075_p13, %p1074_p4 }
  0x52   : > { %p1078_p3 = por %p1077_p10, %p1076_p6 }
  0x54   : > { %p1079_p5 = pnand %p1078_p3, %p1072_p1 }
  0x56   : > { %1082 = shalt.err (!%p1079_p5)
}
  0x57   : > { %s1083_s15 = scalar_lea.vmem %s1382_s6, 128  ;;  %s1192_s27 = smov [#allocation3]  }
  0x58   : > { %p1084_p9 = scmp.ne.s32.totalorder %s1382_s6, %s1083_s15  ;;  %s1088_s8 = sshll.u32 %s1192_s27, 4  ;;  %s1089_s8 = int_to_ptr.vmem [resolvable:$false] %s1088_s8 }
  0x59   : > { %s1090_s10 = scalar_lea.vmem %s1089_s8, 256  ;;  %p1091_p7 = scmp.lt.s32.totalorder %s1382_s6, %s1089_s8 }
  0x5a   : > { %p1086_p11 = pnand %p1084_p9, %p1070_p12  ;;  %p1092_p4 = scmp.lt.s32.totalorder %s1090_s10, %s1083_s15 }
  0x5c   : > { %p1087_p0 = pneg %p1086_p11  ;;  %p1093_p13 = por %p1092_p4, %p1091_p7 }
  0x5e   : > { %p1094_p6 = pnand %p1093_p13, %p1087_p0 }
  0x60   : > { %1097 = shalt.err (!%p1094_p6)
}
  0x61   : > { %940 = dma.hbm_to_vmem [thread:$0]  (!%p1378_p2), %s1374_s25, 128, %s1382_s6, %s223_s11  }
  0x62   : > { %242 = sbr.rel (%p1281_p8) target bundleno = 960 (0x3c0), region = 40  ;;  %s1412_s13 = sand.u32 (!%p1281_p8), 1, %s1168_s19  }
  0x63   : > { %s786_s16 = sshll.u32 (!%p1281_p8), %s1412_s13, 3  ;;  %s245_s24 = scalar_lea.sflag (!%p1281_p8), [#allocation4], %s1412_s13 }
  0x64   : > { %s1418_s7 = scalar_lea.vmem (!%p1281_p8), [#allocation3], %s786_s16  ;;  %p1525_p7 = scmp.ne.s32.totalorder (!%p1281_p8), %s1519_s28, 0 }
  0x69   : > { %1151 = dma.done.wait (%p1525_p7), %s245_s24, 128  }
  0x6a   : > { %1153 = vsyncadd (%p1525_p7), %s245_s24, 4294967168  ;;  %p1526_p2 = scmp.ne.s32.totalorder %s1517_s26, 0 }
  0x6c   : > { %1155 = dma.done.wait (%p1526_p2), [#allocation7], 6144  }
  0x6d   : > { %1157 = vsyncadd (%p1526_p2), [#allocation7], 4294961152  ;;  %v1193_v0 = vmov 0.0|0.0   ;;  %v1194_v1 = vmov 0.0   ;;  %vm1195_vm0 = vmmov 0   ;;  %v289_v2 = vld [vmem:[#allocation8 + $0x8] sm:$0xff] }
  0x6e   : > { %894 = vmatprep.subr.bf16.mxu1 %v1193_v0  ;;  %396 = vmatprep.mubr.f32.mxu0 %v1194_v1  ;;  %v291_v3 = vld [vmem:[#allocation8 + $0x18] sm:$0xff]  ;;  %v288_v4 = vld [vmem:[#allocation8] sm:$0xff]  ;;  %v290_v6 = vld [vmem:[#allocation8 + $0x10] sm:$0xff]  ;;  %vm573_vm1 = vcmask 64512   ;;  %s793_s6 = sshll.u32 %s1176_s21, 7  ;;  %s282_s9 = scalar_lea.vmem [#allocation9], %s786_s16 }
  0x6f   : > { %849 = vmatprep.mubr.msk.f32.mxu1 %vm1195_vm0, %v1194_v1  ;;  %v862_v5 = vpack.c.bf16 %v291_v3, %v289_v2  ;;  %v293_v7 = vld [vmem:[#allocation8 + $0x28] sm:$0xff]  ;;  %v295_v8 = vld [vmem:[#allocation8 + $0x38] sm:$0xff]  ;;  %v864_v9 = vpack.c.bf16 %v290_v6, %v288_v4  ;;  %v408_v11 = vld [vmem:[#allocation6] sm:$0xff]  ;;  %s677_s11 = sshll.u32 %s282_s9, 4  ;;  %s1458_s8 = scalar_lea.hbm %s1512_s5, %s793_s6  ;;  %s1460_s11 = int_to_ptr.vmem [resolvable:$true] %s677_s11 }
  0x70   : > { %v866_v10 = vpack.c.bf16 %v295_v8, %v293_v7  ;;  %v409_v12 = vld [vmem:[#allocation6 + $0x8] sm:$0xff]  ;;  %v292_v13 = vld [vmem:[#allocation8 + $0x20] sm:$0xff]  ;;  %v294_v15 = vld [vmem:[#allocation8 + $0x30] sm:$0xff]  ;;  %s663_s10 = scalar_lea.sflag [#allocation5], %s1412_s13  ;;  %s1098_s21 = scalar_lea.vmem %s1460_s11, 128 }
  0x71   : > { %863 = vmatprep.subr.bf16.mxu0 %v862_v5  ;;  %v895_v14 = vpack.c.bf16 %v409_v12, %v408_v11  ;;  %v297_v16 = vld [vmem:[#allocation8 + $0x48] sm:$0xff]  ;;  %v299_v17 = vld [vmem:[#allocation8 + $0x58] sm:$0xff]  ;;  %v868_v18 = vpack.c.bf16 %v294_v15, %v292_v13  ;;  %v410_v19 = vld [vmem:[#allocation6 + $0x10] sm:$0xff]  ;;  %v322_v13 = vlaneseq  ;;  %p1099_p8 = scmp.ne.s32.totalorder %s1460_s11, %s1098_s21  ;;  %p1527_p12 = scmp.ne.s32.totalorder %s1523_s14, 0 }
  0x72   : > { %865 = vmatpush1.bf16.msra.mxu0 %v864_v9  ;;  %v411_v20 = vld [vmem:[#allocation6 + $0x18] sm:$0xff]  ;;  %v870_v21 = vpack.c.bf16 %v299_v17, %v297_v16  ;;  %v296_v23 = vld [vmem:[#allocation8 + $0x40] sm:$0xff]  ;;  %v298_v24 = vld [vmem:[#allocation8 + $0x50] sm:$0xff]  ;;  %s1196_s16 = smov [#allocation9]  }
  0x73   : > { %867 = vmatprep.subr.bf16.mxu0 %v866_v10  ;;  %896 = vmatpush3.bf16.msra.mxu1 %v895_v14  ;;  %v898_v22 = vpack.c.bf16 %v411_v20, %v410_v19  ;;  %v301_v25 = vld [vmem:[#allocation8 + $0x68] sm:$0xff]  ;;  %v303_v26 = vld [vmem:[#allocation8 + $0x78] sm:$0xff]  ;;  %v412_v27 = vld [vmem:[#allocation6 + $0x20] sm:$0xff]  ;;  %v872_v29 = vpack.c.bf16 %v298_v24, %v296_v23  ;;  %v323_v14 = vshrl.u32 %v322_v13, 7  ;;  %p1100_p1 = pnand %p1099_p8, %p1527_p12  ;;  %s1102_s24 = sshll.u32 %s1196_s16, 4  ;;  %s1103_s24 = int_to_ptr.vmem [resolvable:$false] %s1102_s24 }
  0x74   : > { %897 = vmatprep.subr.bf16.mxu1 %v1193_v0  ;;  %v413_v28 = vld [vmem:[#allocation6 + $0x28] sm:$0xff]  ;;  %v874_v30 = vpack.c.bf16 %v303_v26, %v301_v25  ;;  %v300_v32 = vld [vmem:[#allocation8 + $0x60] sm:$0xff]  ;;  %v302_v33 = vld [vmem:[#allocation8 + $0x70] sm:$0xff]  ;;  %p1105_p3 = scmp.lt.s32.totalorder %s1460_s11, %s1103_s24 }
  0x75   : > { %v901_v31 = vpack.c.bf16 %v413_v28, %v412_v27  ;;  %v305_v34 = vld [vmem:[#allocation8 + $0x88] sm:$0xff]  ;;  %v307_v35 = vld [vmem:[#allocation8 + $0x98] sm:$0xff]  ;;  %v414_v36 = vld [vmem:[#allocation6 + $0x30] sm:$0xff]  ;;  %v876_v38 = vpack.c.bf16 %v302_v33, %v300_v32  ;;  %v324_v15 = vsub.s32 0, %v323_v14  ;;  %v328_v16 = vsub.s32 1, %v323_v14  ;;  %p1101_p10 = pneg %p1100_p1 }
  0x76   : > { %869 = vmatpush1.bf16.msra.mxu0 %v868_v18  ;;  %v415_v37 = vld [vmem:[#allocation6 + $0x38] sm:$0xff]  ;;  %v878_v39 = vpack.c.bf16 %v307_v35, %v305_v34  ;;  %v304_v41 = vld [vmem:[#allocation8 + $0x80] sm:$0xff]  ;;  %v306_v42 = vld [vmem:[#allocation8 + $0x90] sm:$0xff] }
  0x77   : > { %871 = vmatprep.subr.bf16.mxu0 %v870_v21  ;;  %899 = vmatpush3.bf16.msra.mxu1 %v898_v22  ;;  %v904_v40 = vpack.c.bf16 %v415_v37, %v414_v36  ;;  %v309_v43 = vld [vmem:[#allocation8 + $0xa8] sm:$0xff]  ;;  %v311_v44 = vld [vmem:[#allocation8 + $0xb8] sm:$0xff]  ;;  %v416_v45 = vld [vmem:[#allocation6 + $0x40] sm:$0xff]  ;;  %v880_v47 = vpack.c.bf16 %v306_v42, %v304_v41 }
  0x78   : > { %900 = vmatprep.subr.bf16.mxu1 %v1193_v0  ;;  %v417_v46 = vld [vmem:[#allocation6 + $0x48] sm:$0xff]  ;;  %v882_v48 = vpack.c.bf16 %v311_v44, %v309_v43  ;;  %v308_v50 = vld [vmem:[#allocation8 + $0xa0] sm:$0xff]  ;;  %v310_v51 = vld [vmem:[#allocation8 + $0xb0] sm:$0xff] }
  0x79   : > { %v907_v49 = vpack.c.bf16 %v417_v46, %v416_v45  ;;  %v313_v52 = vld [vmem:[#allocation8 + $0xc8] sm:$0xff]  ;;  %v315_v53 = vld [vmem:[#allocation8 + $0xd8] sm:$0xff]  ;;  %v418_v54 = vld [vmem:[#allocation6 + $0x50] sm:$0xff]  ;;  %v884_v56 = vpack.c.bf16 %v310_v51, %v308_v50 }
  0x7a   : > { %873 = vmatpush1.bf16.msra.mxu0 %v872_v29  ;;  %v419_v55 = vld [vmem:[#allocation6 + $0x58] sm:$0xff]  ;;  %v886_v57 = vpack.c.bf16 %v315_v53, %v313_v52  ;;  %v312_v59 = vld [vmem:[#allocation8 + $0xc0] sm:$0xff]  ;;  %v314_v60 = vld [vmem:[#allocation8 + $0xd0] sm:$0xff] }
  0x7b   : > { %875 = vmatprep.subr.bf16.mxu0 %v874_v30  ;;  %902 = vmatpush3.bf16.msra.mxu1 %v901_v31  ;;  %v910_v58 = vpack.c.bf16 %v419_v55, %v418_v54  ;;  %v317_v61 = vld [vmem:[#allocation8 + $0xe8] sm:$0xff]  ;;  %v319_v62 = vld [vmem:[#allocation8 + $0xf8] sm:$0xff]  ;;  %v420_v63 = vld [vmem:[#allocation6 + $0x60] sm:$0xff]  ;;  %v888_v3 = vpack.c.bf16 %v314_v60, %v312_v59 }
  0x7c   : > { %903 = vmatprep.subr.bf16.mxu1 %v1193_v0  ;;  %v421_v2 = vld [vmem:[#allocation6 + $0x68] sm:$0xff]  ;;  %v890_v4 = vpack.c.bf16 %v319_v62, %v317_v61  ;;  %v316_v6 = vld [vmem:[#allocation8 + $0xe0] sm:$0xff]  ;;  %v318_v7 = vld [vmem:[#allocation8 + $0xf0] sm:$0xff] }
  0x7d   : > { %v913_v5 = vpack.c.bf16 %v421_v2, %v420_v63  ;;  %v422_v8 = vld [vmem:[#allocation6 + $0x70] sm:$0xff]  ;;  %v423_v9 = vld [vmem:[#allocation6 + $0x78] sm:$0xff]  ;;  %v892_v10 = vpack.c.bf16 %v318_v7, %v316_v6 }
  0x7e   : > { %877 = vmatpush1.bf16.msra.mxu0 %v876_v38  ;;  %v916_v11 = vpack.c.bf16 %v423_v9, %v422_v8  ;;  %v287_v12 = vld [vmem:[%s1418_s7] sm:$0xff]  ;;  %s1104_s7 = scalar_lea.vmem %s1103_s24, 256 }
  0x7f   : > { %879 = vmatprep.subr.bf16.mxu0 %v878_v39  ;;  %905 = vmatpush3.bf16.msra.mxu1 %v904_v40  ;;  %v790_v19 = vld [vmem:[%s1509_s2] ss:$0 sm:$0xff]  ;;  %p1106_p5 = scmp.lt.s32.totalorder %s1104_s7, %s1098_s21 }
  0x80   : > { %906 = vmatprep.subr.bf16.mxu1 %v1193_v0 }
  0x81   : > { %p1107_p9 = por %p1106_p5, %p1105_p3 }
  0x82   : > { %881 = vmatpush1.bf16.msra.mxu0 %v880_v47 }
  0x83   : > { %883 = vmatprep.subr.bf16.mxu0 %v882_v48  ;;  %908 = vmatpush3.bf16.msra.mxu1 %v907_v49  ;;  %p1108_p11 = pnand %p1107_p9, %p1101_p10 }
  0x84   : > { %909 = vmatprep.subr.bf16.mxu1 %v1193_v0 }
  0x86   : > { %885 = vmatpush1.bf16.msra.mxu0 %v884_v56 }
  0x87   : > { %887 = vmatprep.subr.bf16.mxu0 %v886_v57  ;;  %911 = vmatpush3.bf16.msra.mxu1 %v910_v58 }
  0x88   : > { %912 = vmatprep.subr.bf16.mxu1 %v1193_v0 }
  0x8a   : > { %889 = vmatpush1.bf16.msra.mxu0 %v888_v3 }
  0x8b   : > { %891 = vmatprep.subr.bf16.mxu0 %v890_v4  ;;  %914 = vmatpush3.bf16.msra.mxu1 %v913_v5 }
  0x8c   : > { %915 = vmatprep.subr.bf16.mxu1 %v1193_v0  ;;  %v320_v0 = vld [vmem:[%s1511_s4] sm:$0x3] }
  0x8d   : > { %v325_v17 = vrot.slane %v320_v0, %v324_v15  ;;  %v329_v18 = vrot.slane %v320_v0, %v328_v16 }
  0x8e   : > { %893 = vmatpush1.bf16.msra.mxu0 %v892_v10 }
  0x8f   : > { %917 = vmatpush3.bf16.msra.mxu1 %v916_v11  ;;  %852 = vmatprep.subr.mxu0 %v1194_v1 }
  0x90   : > { %857 = vmatprep.subr.mxu1 %v1194_v1 }
  0x91   : > { %397 = vmatmul.mubr.f32.vlgmr.msra.gmra.mrb[0].mxu0 %v287_v12 }
  0x92   : > { %850 = vmatmul.mubr.f32.vlgmr.msra.gmra.mrb[0].mxu1 %v287_v12  ;;  %854 = vmatprep.mubr.msk.f32.mxu0 %vm1195_vm0, %v1194_v1 }
  0x93   : > { %859 = vmatprep.mubr.msk.f32.mxu1 %vm1195_vm0, %v1194_v1 }
 0x164   : > { %v398_v20 = vpop.f32.mrb[0].mxu0 }
 0x165   : > { %v399_v21 = vadd.f32 %v398_v20, %v325_v17  ;;  %v400_v22 = vpop.f32.mrb[1].mxu0  ;;  %v497_v23 = vpop.f32.mrb[0].mxu1 }
 0x166   : > { %v401_v24 = vadd.f32 %v400_v22, %v329_v18  ;;  %v498_v1 = vadd.f32 %v790_v19, %v497_v23  ;;  %v851_v25 = vpop.f32.mrb[1].mxu1 }
 0x167   : > { %853 = vmatpush3.xpose.msra.mxu0 %v399_v21 }
 0x168   : > { %858 = vmatpush3.msra.mxu1 %v401_v24 }
 0x16a   : > { %855 = vmatmul.mubr.f32.vlgmr.msra.gmra.mrb[2].mxu0 %v498_v1 }
 0x23d   : > { %v569_v26 = vpop.f32.mrb[2].mxu0 }
 0x23e   : > { %v856_v27 = vpop.f32.mrb[3].mxu0  ;;  %v574_v28 = vsel %vm573_vm1, %v569_v26, -inf }
 0x23f   : > { %575 = vmax.xlane.f32.xlu0 %v574_v28 }
 0x2cc   : > { %v576_v29 = vpop.xlane.xlu0 %575 }
 0x2cd   : > { %v577_v30 = vsub.f32 %v569_v26, %v576_v29 }
 0x2cf   : > { %v578_v31 = vmul.f32 1.442695, %v577_v30 }
 0x2d1   : > { %1008 = vpow2.f32 %v578_v31 }
 0x2db   : > { %v1009_v32 = vpop.eup %1008 }
 0x2dc   : > { %860 = vmatmul.mubr.msk.f32.vlgmr.msra.gmra.mrb[2].mxu1 %vm573_vm1, %v1009_v32  ;;  %v580_v33 = vsel %vm573_vm1, %v1009_v32, 0.0 }
 0x2dd   : > { %581 = vadd.xlane.f32.xlu0 %v580_v33 }
 0x36a   : > { %v582_v34 = vpop.xlane.xlu0 %581 }
 0x36b   : > { %1010 = vrcp.f32 %v582_v34 }
 0x375   : > { %v1011_v35 = vpop.eup %1010 }
 0x376   : > { %v657_v36 = vmul.f32 %v1011_v35, %v582_v34 }
 0x378   : > { %v658_v37 = vsub.f32 2.0, %v657_v36 }
 0x37a   : > { %v659_v38 = vmul.f32 %v1011_v35, %v658_v37 }
 0x3af   : > { %v652_v39 = vpop.f32.mrb[2].mxu1 }
 0x3b0   : > { %v660_v40 = vmul.f32 %v659_v38, %v652_v39  ;;  %v861_v41 = vpop.f32.mrb[3].mxu1 }
 0x3b2   : > { %661 = vst [vmem:[%s282_s9] sm:$0xff] %v660_v40 }
 0x3b3   : > { %1111 = shalt.err (!%p1108_p11)
}
 0x3b4   : > { %s1112_s13 = scalar_lea.hbm %s1458_s8, 128  ;;  %s1116_s30 = scalar_lea.hbm %s1512_s5, 256 }
 0x3b5   : > { %p1113_p0 = scmp.ne.s32.totalorder %s1458_s8, %s1112_s13  ;;  %p1117_p6 = scmp.lt.u32.totalorder %s1458_s8, %s1512_s5 }
 0x3b6   : > { %p1118_p7 = scmp.lt.u32.totalorder %s1116_s30, %s1112_s13  ;;  %p1120_p8 = scmp.lt.u32.totalorder %s1112_s13, %s1458_s8 }
 0x3b7   : > { %p1114_p4 = pnand %p1113_p0, %p1527_p12 }
 0x3b8   : > { %p1119_p2 = por %p1118_p7, %p1117_p6 }
 0x3b9   : > { %p1115_p13 = pneg %p1114_p4 }
 0x3ba   : > { %p1121_p1 = por %p1120_p8, %p1119_p2 }
 0x3bc   : > { %p1122_p10 = pnand %p1121_p1, %p1115_p13 }
 0x3be   : > { %1125 = shalt.err (!%p1122_p10)
}
 0x3bf   : > { %928 = dma.vmem_to_hbm [thread:$0]  (%p1527_p12), %s1460_s11, 128, %s1458_s8, %s663_s10  }
 0x3c0 PF: > { %s689_s9 = sand.u32 1, %s1164_s18   ;;  %p1528_p3 = scmp.ne.s32.totalorder %s1520_s29, 0 }
 0x3c1   : > { %p1529_p5 = scmp.ge.s32.totalorder %s1184_s23, 2  ;;  %s690_s15 = scalar_lea.sflag [#allocation5], %s689_s9 }
 0x3c3   : > { %p942_p9 = pnand %p1529_p5, %p1528_p3 }
 0x3c5   : > { %1159 = dma.done.wait (!%p942_p9), %s690_s15, 128  }
 0x3c6   : > { %1161 = vsyncadd (!%p942_p9), %s690_s15, 4294967168  ;;  %s22_s23 = sadd.s32 1, %s1184_s23   ;;  %s1530_s18 = smov %s1168_s19 }
 0x3c7   : > { %p19_p11 = scmp.ge.s32.totalorder %s22_s23, 4   ;;  %s1531_s19 = smov %s1172_s20 }
 0x3c8   : > { %s1532_s20 = smov %s1369_s17  ;;  %s1533_s21 = smov %s1180_s22 }
 0x3c9   : > { %s1534_s22 = smov %s1536_s12  ;;  %21 = sbr.rel (!%p19_p11) target bundleno = 7 (0x7), region = 98 }
 0x3d0   :  { %695 = vsyncpa [#allocation4], 1 }
 0x3d1   :  { %697 = vsyncpa [#allocation4 + $0x1], 1 }
 0x3d2   :  { %698 = vsyncpa [#allocation7], 1 }
 0x3d3   :  { %699 = vsyncpa [#allocation5], 1 }
 0x3d4   :  { %701 = vsyncpa [#allocation5 + $0x1], 1 }

</bundles_post_ra>
